<compile_context>
chip_gen: v5e
topology: v5e:2x2
jax: 0.10.0
libtpu: 0.0.40
codegen_flags: <defaults>
</compile_context>

<pallas_src>
import jax
import jax.numpy as jnp
from jax.experimental import pallas as pl
from jax.experimental.pallas import tpu as pltpu


# ---------------------------------------------------------------------------
# Pallas kernel: encoder MLP -> emb, decoder MLP -> logits block, softmax(dim=0)
# ---------------------------------------------------------------------------
def _ae_kernel(x_ref,
               we1, be1, we2, be2, we3, be3, we4, be4,      # encoder params
               wd1, bd1, wd2, bd2, wd3, bd3, wd4, bd4,      # decoder params
               emb_out, probs_out):
    f32 = jnp.float32
    bf16 = jnp.bfloat16

    def dense(h, w_ref, b_ref, relu):
        # bf16 operands on the MXU, f32 accumulation, f32 bias add / ReLU.
        y = jnp.dot(h.astype(bf16), w_ref[...], preferred_element_type=f32)
        y = y + b_ref[...]
        return jnp.maximum(y, 0.0) if relu else y

    h = x_ref[...]                                  # (B, max_length*20), f32

    # ---- encoder: 600 -> 128 -> 64 -> 16 -> 8 (recomputed per column block;
    #      weights are VMEM-resident, FLOPs negligible vs. the wd4 block) ----
    h = dense(h, we1, be1, relu=True)
    h = dense(h, we2, be2, relu=True)
    h = dense(h, we3, be3, relu=True)
    emb = dense(h, we4, be4, relu=False)            # (B, 8)
    emb_out[...] = emb                              # identical value every block

    # ---- decoder prefix: 8 -> 16 -> 64 -> 128 ----
    d = dense(emb, wd1, bd1, relu=True)
    d = dense(d, wd2, bd2, relu=True)
    d = dense(d, wd3, bd3, relu=True)

    # ---- final layer, current column block: (B,128) @ (128, col_blk) ----
    logits = dense(d, wd4, bd4, relu=False)         # (B, col_blk)

    # ---- softmax over dim=0 (legacy nn.Softmax() behavior for 3-D input);
    #      per-column over batch, independent across column blocks ----
    m = jnp.max(logits, axis=0, keepdims=True)
    e = jnp.exp(logits - m)
    denom = jnp.sum(e, axis=0, keepdims=True)
    probs_out[...] = e * pl.reciprocal(denom, approx=False)


# ---------------------------------------------------------------------------
# Wrapper: embedding glue + column-gridded pallas_call
# ---------------------------------------------------------------------------
def autoencoder_forward(x_idx, params, *, number_of_characters, max_length,
                        emb_dim=20, col_block=256):
    """x_idx: int32 [B, max_length] character indices -> (probs, emb)."""
    assert col_block % 128 == 0, "column block must be lane-aligned (multiple of 128)"
    B = x_idx.shape[0]
    in_dim = max_length * emb_dim
    out_dim = max_length * number_of_characters
    out_pad = ((out_dim + col_block - 1) // col_block) * col_block
    n_blocks = out_pad // col_block

    # Glue: embedding lookup + flatten (gather; not the matmul hot path).
    embedded = jnp.take(params["emb_table"], x_idx, axis=0)        # (B, L, 20)
    flat = embedded.reshape(B, in_dim).astype(jnp.float32)

    bf16 = jnp.bfloat16
    # Weights -> bf16 (halves dominant HBM->VMEM DMA); biases stay f32.
    wd4p = jnp.pad(params["wd4"].astype(bf16), ((0, 0), (0, out_pad - out_dim)))
    bd4p = jnp.pad(params["bd4"], ((0, 0), (0, out_pad - out_dim)))

    resident = [
        params["we1"].astype(bf16), params["be1"],
        params["we2"].astype(bf16), params["be2"],
        params["we3"].astype(bf16), params["be3"],
        params["we4"].astype(bf16), params["be4"],
        params["wd1"].astype(bf16), params["bd1"],
        params["wd2"].astype(bf16), params["bd2"],
        params["wd3"].astype(bf16), params["bd3"],
    ]
    args = [flat] + resident + [wd4p, bd4p]

    def resident_spec(arr):
        return pl.BlockSpec(arr.shape, lambda j: (0,) * arr.ndim)

    in_specs = (
        [pl.BlockSpec((B, in_dim), lambda j: (0, 0))]               # x: resident
        + [resident_spec(a) for a in resident]                      # small weights
        + [pl.BlockSpec((128, col_block), lambda j: (0, j)),        # wd4: col-blocked
           pl.BlockSpec((1, col_block), lambda j: (0, j))]          # bd4: col-blocked
    )
    out_specs = [
        pl.BlockSpec((B, 8), lambda j: (0, 0)),                     # emb (resident)
        pl.BlockSpec((B, col_block), lambda j: (0, j)),             # probs (padded)
    ]

    macs = (in_dim * 128 + 128 * 64 + 64 * 16 + 16 * 8
            + 8 * 16 + 16 * 64 + 64 * 128 + 128 * out_pad)
    cost = pl.CostEstimate(
        flops=int(2 * B * macs),
        transcendentals=int(B * out_pad),
        bytes_accessed=int(sum(a.size * a.dtype.itemsize for a in args)
                           + B * (8 + out_pad) * 4),
    )

    emb, probs_pad = pl.pallas_call(
        _ae_kernel,
        out_shape=(
            jax.ShapeDtypeStruct((B, 8), jnp.float32),          # emb
            jax.ShapeDtypeStruct((B, out_pad), jnp.float32),    # softmax(logits), padded
        ),
        grid_spec=pltpu.PrefetchScalarGridSpec(
            num_scalar_prefetch=0,
            grid=(n_blocks,),
            in_specs=in_specs,
            out_specs=out_specs,
        ),
        compiler_params=pltpu.CompilerParams(
            dimension_semantics=("parallel",),        # v7x: split blocks over 2 TCs
            vmem_limit_bytes=32 * 1024 * 1024,        # explicit; fits v5e/v6e/v7x
        ),
        cost_estimate=cost,
    )(*args)

    probs = probs_pad[:, :out_dim].reshape(B, max_length, number_of_characters)
    return probs, emb


# ---------------------------------------------------------------------------
# Deterministic parameter construction (shapes dictated by module __init__)
# ---------------------------------------------------------------------------
def init_params(key, number_of_characters, max_length, emb_dim=20):
    dims_enc = [(max_length * emb_dim, 128), (128, 64), (64, 16), (16, 8)]
    dims_dec = [(8, 16), (16, 64), (64, 128), (128, max_length * number_of_characters)]

    params = {}
    key, ek = jax.random.split(key)
    params["emb_table"] = jax.random.normal(ek, (number_of_characters, emb_dim),
                                            jnp.float32)

    def make(prefix, dims, key):
        for i, (fin, fout) in enumerate(dims, start=1):
            key, kw, kb = jax.random.split(key, 3)
            bound = 1.0 / (fin ** 0.5)
            params[f"{prefix}{i}"] = jax.random.uniform(
                kw, (fin, fout), jnp.float32, -bound, bound)          # W: [in, out]
            params[f"{prefix.replace('w', 'b')}{i}"] = jax.random.uniform(
                kb, (1, fout), jnp.float32, -bound, bound)            # b: [1, out]
        return key

    key = make("we", dims_enc, key)
    key = make("wd", dims_dec, key)
    return params


if __name__ == "__main__":
    number_of_characters = 40
    max_length = 30
    batch = 8

    key = jax.random.PRNGKey(0)
    key, pk, xk = jax.random.split(key, 3)
    params = init_params(pk, number_of_characters, max_length)

    x = jax.random.randint(xk, (batch, max_length), 0, number_of_characters,
                           dtype=jnp.int32)

    probs, emb = autoencoder_forward(
        x, params,
        number_of_characters=number_of_characters,
        max_length=max_length,
    )
    jax.block_until_ready((probs, emb))

    assert probs.shape == (batch, max_length, number_of_characters)
    assert emb.shape == (batch, 8)
    # softmax over dim=0 -> each (length, char) column sums to 1 across batch
    assert jnp.allclose(jnp.sum(probs, axis=0), 1.0, atol=1e-4)

    print("KERNEL_OK")
</pallas_src>

<mosaic_0001>
module attributes {stable_mosaic.version = 11 : i64} {
  func.func @_ae_kernel(%arg0: i32, %arg1: memref<8x600xf32, #tpu.memory_space<vmem>>, %arg2: memref<600x128xbf16, #tpu.memory_space<vmem>>, %arg3: memref<1x128xf32, #tpu.memory_space<vmem>>, %arg4: memref<128x64xbf16, #tpu.memory_space<vmem>>, %arg5: memref<1x64xf32, #tpu.memory_space<vmem>>, %arg6: memref<64x16xbf16, #tpu.memory_space<vmem>>, %arg7: memref<1x16xf32, #tpu.memory_space<vmem>>, %arg8: memref<16x8xbf16, #tpu.memory_space<vmem>>, %arg9: memref<1x8xf32, #tpu.memory_space<vmem>>, %arg10: memref<8x16xbf16, #tpu.memory_space<vmem>>, %arg11: memref<1x16xf32, #tpu.memory_space<vmem>>, %arg12: memref<16x64xbf16, #tpu.memory_space<vmem>>, %arg13: memref<1x64xf32, #tpu.memory_space<vmem>>, %arg14: memref<64x128xbf16, #tpu.memory_space<vmem>>, %arg15: memref<1x128xf32, #tpu.memory_space<vmem>>, %arg16: memref<128x256xbf16, #tpu.memory_space<vmem>>, %arg17: memref<1x256xf32, #tpu.memory_space<vmem>>, %arg18: memref<8x8xf32, #tpu.memory_space<vmem>>, %arg19: memref<8x256xf32, #tpu.memory_space<vmem>>) attributes {dimension_semantics = [#tpu.dimension_semantics<parallel>], iteration_bounds = array<i64: 5>, scalar_prefetch = 0 : i64, scratch_operands = 0 : i64, tpu.core_type = #tpu.core_type<tc>, window_params = [{pipeline_mode = #tpu.pipeline_mode<synchronous>, transform_indices = @transform_0, window_bounds = array<i64: 8, 600>}, {pipeline_mode = #tpu.pipeline_mode<synchronous>, transform_indices = @transform_1, window_bounds = array<i64: 600, 128>}, {pipeline_mode = #tpu.pipeline_mode<synchronous>, transform_indices = @transform_2, window_bounds = array<i64: 1, 128>}, {pipeline_mode = #tpu.pipeline_mode<synchronous>, transform_indices = @transform_3, window_bounds = array<i64: 128, 64>}, {pipeline_mode = #tpu.pipeline_mode<synchronous>, transform_indices = @transform_4, window_bounds = array<i64: 1, 64>}, {pipeline_mode = #tpu.pipeline_mode<synchronous>, transform_indices = @transform_5, window_bounds = array<i64: 64, 16>}, {pipeline_mode = #tpu.pipeline_mode<synchronous>, transform_indices = @transform_6, window_bounds = array<i64: 1, 16>}, {pipeline_mode = #tpu.pipeline_mode<synchronous>, transform_indices = @transform_7, window_bounds = array<i64: 16, 8>}, {pipeline_mode = #tpu.pipeline_mode<synchronous>, transform_indices = @transform_8, window_bounds = array<i64: 1, 8>}, {pipeline_mode = #tpu.pipeline_mode<synchronous>, transform_indices = @transform_9, window_bounds = array<i64: 8, 16>}, {pipeline_mode = #tpu.pipeline_mode<synchronous>, transform_indices = @transform_10, window_bounds = array<i64: 1, 16>}, {pipeline_mode = #tpu.pipeline_mode<synchronous>, transform_indices = @transform_11, window_bounds = array<i64: 16, 64>}, {pipeline_mode = #tpu.pipeline_mode<synchronous>, transform_indices = @transform_12, window_bounds = array<i64: 1, 64>}, {pipeline_mode = #tpu.pipeline_mode<synchronous>, transform_indices = @transform_13, window_bounds = array<i64: 64, 128>}, {pipeline_mode = #tpu.pipeline_mode<synchronous>, transform_indices = @transform_14, window_bounds = array<i64: 1, 128>}, {transform_indices = @transform_15, window_bounds = array<i64: 128, 256>}, {transform_indices = @transform_16, window_bounds = array<i64: 1, 256>}, {pipeline_mode = #tpu.pipeline_mode<synchronous>, transform_indices = @transform_17, window_bounds = array<i64: 8, 8>}, {transform_indices = @transform_18, window_bounds = array<i64: 8, 256>}]} {
    %c0 = arith.constant 0 : index
    %c0_0 = arith.constant 0 : index
    %0 = vector.load %arg1[%c0, %c0_0] : memref<8x600xf32, #tpu.memory_space<vmem>>, vector<8x600xf32>
    %1 = arith.truncf %0 : vector<8x600xf32> to vector<8x600xbf16>
    %c0_1 = arith.constant 0 : index
    %c0_2 = arith.constant 0 : index
    %2 = vector.load %arg2[%c0_1, %c0_2] : memref<600x128xbf16, #tpu.memory_space<vmem>>, vector<600x128xbf16>
    %cst = arith.constant dense<0.000000e+00> : vector<8x128xf32>
    %3 = tpu.matmul %1, %2, %cst {dimension_numbers = #tpu.dot_dimension_numbers<[1], [0], [0], [1], [0, 0, 1, 1], [], []>} : vector<8x600xbf16>, vector<600x128xbf16>, vector<8x128xf32> -> vector<8x128xf32>
    %c0_3 = arith.constant 0 : index
    %c0_4 = arith.constant 0 : index
    %4 = vector.load %arg3[%c0_3, %c0_4] : memref<1x128xf32, #tpu.memory_space<vmem>>, vector<1x128xf32>
    %5 = vector.broadcast %4 : vector<1x128xf32> to vector<8x128xf32>
    %6 = arith.addf %3, %5 : vector<8x128xf32>
    %cst_5 = arith.constant 0.000000e+00 : f32
    %7 = vector.broadcast %cst_5 : f32 to vector<8x128xf32>
    %8 = arith.maximumf %6, %7 : vector<8x128xf32>
    %9 = arith.truncf %8 : vector<8x128xf32> to vector<8x128xbf16>
    %c0_6 = arith.constant 0 : index
    %c0_7 = arith.constant 0 : index
    %10 = vector.load %arg4[%c0_6, %c0_7] : memref<128x64xbf16, #tpu.memory_space<vmem>>, vector<128x64xbf16>
    %cst_8 = arith.constant dense<0.000000e+00> : vector<8x64xf32>
    %11 = tpu.matmul %9, %10, %cst_8 {dimension_numbers = #tpu.dot_dimension_numbers<[1], [0], [0], [1], [0, 0, 1, 1], [], []>} : vector<8x128xbf16>, vector<128x64xbf16>, vector<8x64xf32> -> vector<8x64xf32>
    %c0_9 = arith.constant 0 : index
    %c0_10 = arith.constant 0 : index
    %12 = vector.load %arg5[%c0_9, %c0_10] : memref<1x64xf32, #tpu.memory_space<vmem>>, vector<1x64xf32>
    %13 = vector.broadcast %12 : vector<1x64xf32> to vector<8x64xf32>
    %14 = arith.addf %11, %13 : vector<8x64xf32>
    %cst_11 = arith.constant 0.000000e+00 : f32
    %15 = vector.broadcast %cst_11 : f32 to vector<8x64xf32>
    %16 = arith.maximumf %14, %15 : vector<8x64xf32>
    %17 = arith.truncf %16 : vector<8x64xf32> to vector<8x64xbf16>
    %c0_12 = arith.constant 0 : index
    %c0_13 = arith.constant 0 : index
    %18 = vector.load %arg6[%c0_12, %c0_13] : memref<64x16xbf16, #tpu.memory_space<vmem>>, vector<64x16xbf16>
    %cst_14 = arith.constant dense<0.000000e+00> : vector<8x16xf32>
    %19 = tpu.matmul %17, %18, %cst_14 {dimension_numbers = #tpu.dot_dimension_numbers<[1], [0], [0], [1], [0, 0, 1, 1], [], []>} : vector<8x64xbf16>, vector<64x16xbf16>, vector<8x16xf32> -> vector<8x16xf32>
    %c0_15 = arith.constant 0 : index
    %c0_16 = arith.constant 0 : index
    %20 = vector.load %arg7[%c0_15, %c0_16] : memref<1x16xf32, #tpu.memory_space<vmem>>, vector<1x16xf32>
    %21 = vector.broadcast %20 : vector<1x16xf32> to vector<8x16xf32>
    %22 = arith.addf %19, %21 : vector<8x16xf32>
    %cst_17 = arith.constant 0.000000e+00 : f32
    %23 = vector.broadcast %cst_17 : f32 to vector<8x16xf32>
    %24 = arith.maximumf %22, %23 : vector<8x16xf32>
    %25 = arith.truncf %24 : vector<8x16xf32> to vector<8x16xbf16>
    %c0_18 = arith.constant 0 : index
    %c0_19 = arith.constant 0 : index
    %26 = vector.load %arg8[%c0_18, %c0_19] : memref<16x8xbf16, #tpu.memory_space<vmem>>, vector<16x8xbf16>
    %cst_20 = arith.constant dense<0.000000e+00> : vector<8x8xf32>
    %27 = tpu.matmul %25, %26, %cst_20 {dimension_numbers = #tpu.dot_dimension_numbers<[1], [0], [0], [1], [0, 0, 1, 1], [], []>} : vector<8x16xbf16>, vector<16x8xbf16>, vector<8x8xf32> -> vector<8x8xf32>
    %c0_21 = arith.constant 0 : index
    %c0_22 = arith.constant 0 : index
    %28 = vector.load %arg9[%c0_21, %c0_22] : memref<1x8xf32, #tpu.memory_space<vmem>>, vector<1x8xf32>
    %29 = vector.broadcast %28 : vector<1x8xf32> to vector<8x8xf32>
    %30 = arith.addf %27, %29 : vector<8x8xf32>
    %c0_23 = arith.constant 0 : index
    %c0_24 = arith.constant 0 : index
    %31 = vector.load %arg18[%c0_23, %c0_24] : memref<8x8xf32, #tpu.memory_space<vmem>>, vector<8x8xf32>
    tpu.vector_store %arg18[%c0_23, %c0_24], %30 {strides = array<i32>} : memref<8x8xf32, #tpu.memory_space<vmem>>, vector<8x8xf32>,
    %32 = arith.truncf %30 : vector<8x8xf32> to vector<8x8xbf16>
    %c0_25 = arith.constant 0 : index
    %c0_26 = arith.constant 0 : index
    %33 = vector.load %arg10[%c0_25, %c0_26] : memref<8x16xbf16, #tpu.memory_space<vmem>>, vector<8x16xbf16>
    %cst_27 = arith.constant dense<0.000000e+00> : vector<8x16xf32>
    %34 = tpu.matmul %32, %33, %cst_27 {dimension_numbers = #tpu.dot_dimension_numbers<[1], [0], [0], [1], [0, 0, 1, 1], [], []>} : vector<8x8xbf16>, vector<8x16xbf16>, vector<8x16xf32> -> vector<8x16xf32>
    %c0_28 = arith.constant 0 : index
    %c0_29 = arith.constant 0 : index
    %35 = vector.load %arg11[%c0_28, %c0_29] : memref<1x16xf32, #tpu.memory_space<vmem>>, vector<1x16xf32>
    %36 = vector.broadcast %35 : vector<1x16xf32> to vector<8x16xf32>
    %37 = arith.addf %34, %36 : vector<8x16xf32>
    %cst_30 = arith.constant 0.000000e+00 : f32
    %38 = vector.broadcast %cst_30 : f32 to vector<8x16xf32>
    %39 = arith.maximumf %37, %38 : vector<8x16xf32>
    %40 = arith.truncf %39 : vector<8x16xf32> to vector<8x16xbf16>
    %c0_31 = arith.constant 0 : index
    %c0_32 = arith.constant 0 : index
    %41 = vector.load %arg12[%c0_31, %c0_32] : memref<16x64xbf16, #tpu.memory_space<vmem>>, vector<16x64xbf16>
    %cst_33 = arith.constant dense<0.000000e+00> : vector<8x64xf32>
    %42 = tpu.matmul %40, %41, %cst_33 {dimension_numbers = #tpu.dot_dimension_numbers<[1], [0], [0], [1], [0, 0, 1, 1], [], []>} : vector<8x16xbf16>, vector<16x64xbf16>, vector<8x64xf32> -> vector<8x64xf32>
    %c0_34 = arith.constant 0 : index
    %c0_35 = arith.constant 0 : index
    %43 = vector.load %arg13[%c0_34, %c0_35] : memref<1x64xf32, #tpu.memory_space<vmem>>, vector<1x64xf32>
    %44 = vector.broadcast %43 : vector<1x64xf32> to vector<8x64xf32>
    %45 = arith.addf %42, %44 : vector<8x64xf32>
    %cst_36 = arith.constant 0.000000e+00 : f32
    %46 = vector.broadcast %cst_36 : f32 to vector<8x64xf32>
    %47 = arith.maximumf %45, %46 : vector<8x64xf32>
    %48 = arith.truncf %47 : vector<8x64xf32> to vector<8x64xbf16>
    %c0_37 = arith.constant 0 : index
    %c0_38 = arith.constant 0 : index
    %49 = vector.load %arg14[%c0_37, %c0_38] : memref<64x128xbf16, #tpu.memory_space<vmem>>, vector<64x128xbf16>
    %cst_39 = arith.constant dense<0.000000e+00> : vector<8x128xf32>
    %50 = tpu.matmul %48, %49, %cst_39 {dimension_numbers = #tpu.dot_dimension_numbers<[1], [0], [0], [1], [0, 0, 1, 1], [], []>} : vector<8x64xbf16>, vector<64x128xbf16>, vector<8x128xf32> -> vector<8x128xf32>
    %c0_40 = arith.constant 0 : index
    %c0_41 = arith.constant 0 : index
    %51 = vector.load %arg15[%c0_40, %c0_41] : memref<1x128xf32, #tpu.memory_space<vmem>>, vector<1x128xf32>
    %52 = vector.broadcast %51 : vector<1x128xf32> to vector<8x128xf32>
    %53 = arith.addf %50, %52 : vector<8x128xf32>
    %cst_42 = arith.constant 0.000000e+00 : f32
    %54 = vector.broadcast %cst_42 : f32 to vector<8x128xf32>
    %55 = arith.maximumf %53, %54 : vector<8x128xf32>
    %56 = arith.truncf %55 : vector<8x128xf32> to vector<8x128xbf16>
    %c0_43 = arith.constant 0 : index
    %c0_44 = arith.constant 0 : index
    %57 = vector.load %arg16[%c0_43, %c0_44] : memref<128x256xbf16, #tpu.memory_space<vmem>>, vector<128x256xbf16>
    %cst_45 = arith.constant dense<0.000000e+00> : vector<8x256xf32>
    %58 = tpu.matmul %56, %57, %cst_45 {dimension_numbers = #tpu.dot_dimension_numbers<[1], [0], [0], [1], [0, 0, 1, 1], [], []>} : vector<8x128xbf16>, vector<128x256xbf16>, vector<8x256xf32> -> vector<8x256xf32>
    %c0_46 = arith.constant 0 : index
    %c0_47 = arith.constant 0 : index
    %59 = vector.load %arg17[%c0_46, %c0_47] : memref<1x256xf32, #tpu.memory_space<vmem>>, vector<1x256xf32>
    %60 = vector.broadcast %59 : vector<1x256xf32> to vector<8x256xf32>
    %61 = arith.addf %58, %60 : vector<8x256xf32>
    %cst_48 = arith.constant dense<0xFF800000> : vector<256xf32>
    %62 = vector.multi_reduction <maximumf>, %61, %cst_48 [0] : vector<8x256xf32> to vector<256xf32>
    %63 = vector.shape_cast %62 : vector<256xf32> to vector<1x256xf32>
    %64 = vector.broadcast %63 : vector<1x256xf32> to vector<8x256xf32>
    %65 = arith.subf %61, %64 : vector<8x256xf32>
    %66 = math.exp %65 : vector<8x256xf32>
    %cst_49 = arith.constant dense<0.000000e+00> : vector<256xf32>
    %67 = vector.multi_reduction <add>, %66, %cst_49 [0] : vector<8x256xf32> to vector<256xf32>
    %68 = vector.shape_cast %67 : vector<256xf32> to vector<1x256xf32>
    %69 = tpu.reciprocal %68 : vector<1x256xf32> -> vector<1x256xf32>
    %70 = vector.broadcast %69 : vector<1x256xf32> to vector<8x256xf32>
    %71 = arith.mulf %66, %70 : vector<8x256xf32>
    %c0_50 = arith.constant 0 : index
    %c0_51 = arith.constant 0 : index
    %72 = vector.load %arg19[%c0_50, %c0_51] : memref<8x256xf32, #tpu.memory_space<vmem>>, vector<8x256xf32>
    tpu.vector_store %arg19[%c0_50, %c0_51], %71 {strides = array<i32>} : memref<8x256xf32, #tpu.memory_space<vmem>>, vector<8x256xf32>,
    return
  }
  func.func @transform_0(%arg0: i32) -> (i32, i32) {
    %c0_i32 = arith.constant 0 : i32
    %c0_i32_0 = arith.constant 0 : i32
    %c0_i32_1 = arith.constant 0 : i32
    return %c0_i32, %c0_i32_0 : i32, i32
  }
  func.func @transform_1(%arg0: i32) -> (i32, i32) {
    %c0_i32 = arith.constant 0 : i32
    %c0_i32_0 = arith.constant 0 : i32
    %c0_i32_1 = arith.constant 0 : i32
    return %c0_i32, %c0_i32_0 : i32, i32
  }
  func.func @transform_2(%arg0: i32) -> (i32, i32) {
    %c0_i32 = arith.constant 0 : i32
    %c0_i32_0 = arith.constant 0 : i32
    %c0_i32_1 = arith.constant 0 : i32
    return %c0_i32, %c0_i32_0 : i32, i32
  }
  func.func @transform_3(%arg0: i32) -> (i32, i32) {
    %c0_i32 = arith.constant 0 : i32
    %c0_i32_0 = arith.constant 0 : i32
    %c0_i32_1 = arith.constant 0 : i32
    return %c0_i32, %c0_i32_0 : i32, i32
  }
  func.func @transform_4(%arg0: i32) -> (i32, i32) {
    %c0_i32 = arith.constant 0 : i32
    %c0_i32_0 = arith.constant 0 : i32
    %c0_i32_1 = arith.constant 0 : i32
    return %c0_i32, %c0_i32_0 : i32, i32
  }
  func.func @transform_5(%arg0: i32) -> (i32, i32) {
    %c0_i32 = arith.constant 0 : i32
    %c0_i32_0 = arith.constant 0 : i32
    %c0_i32_1 = arith.constant 0 : i32
    return %c0_i32, %c0_i32_0 : i32, i32
  }
  func.func @transform_6(%arg0: i32) -> (i32, i32) {
    %c0_i32 = arith.constant 0 : i32
    %c0_i32_0 = arith.constant 0 : i32
    %c0_i32_1 = arith.constant 0 : i32
    return %c0_i32, %c0_i32_0 : i32, i32
  }
  func.func @transform_7(%arg0: i32) -> (i32, i32) {
    %c0_i32 = arith.constant 0 : i32
    %c0_i32_0 = arith.constant 0 : i32
    %c0_i32_1 = arith.constant 0 : i32
    return %c0_i32, %c0_i32_0 : i32, i32
  }
  func.func @transform_8(%arg0: i32) -> (i32, i32) {
    %c0_i32 = arith.constant 0 : i32
    %c0_i32_0 = arith.constant 0 : i32
    %c0_i32_1 = arith.constant 0 : i32
    return %c0_i32, %c0_i32_0 : i32, i32
  }
  func.func @transform_9(%arg0: i32) -> (i32, i32) {
    %c0_i32 = arith.constant 0 : i32
    %c0_i32_0 = arith.constant 0 : i32
    %c0_i32_1 = arith.constant 0 : i32
    return %c0_i32, %c0_i32_0 : i32, i32
  }
  func.func @transform_10(%arg0: i32) -> (i32, i32) {
    %c0_i32 = arith.constant 0 : i32
    %c0_i32_0 = arith.constant 0 : i32
    %c0_i32_1 = arith.constant 0 : i32
    return %c0_i32, %c0_i32_0 : i32, i32
  }
  func.func @transform_11(%arg0: i32) -> (i32, i32) {
    %c0_i32 = arith.constant 0 : i32
    %c0_i32_0 = arith.constant 0 : i32
    %c0_i32_1 = arith.constant 0 : i32
    return %c0_i32, %c0_i32_0 : i32, i32
  }
  func.func @transform_12(%arg0: i32) -> (i32, i32) {
    %c0_i32 = arith.constant 0 : i32
    %c0_i32_0 = arith.constant 0 : i32
    %c0_i32_1 = arith.constant 0 : i32
    return %c0_i32, %c0_i32_0 : i32, i32
  }
  func.func @transform_13(%arg0: i32) -> (i32, i32) {
    %c0_i32 = arith.constant 0 : i32
    %c0_i32_0 = arith.constant 0 : i32
    %c0_i32_1 = arith.constant 0 : i32
    return %c0_i32, %c0_i32_0 : i32, i32
  }
  func.func @transform_14(%arg0: i32) -> (i32, i32) {
    %c0_i32 = arith.constant 0 : i32
    %c0_i32_0 = arith.constant 0 : i32
    %c0_i32_1 = arith.constant 0 : i32
    return %c0_i32, %c0_i32_0 : i32, i32
  }
  func.func @transform_15(%arg0: i32) -> (i32, i32) {
    %c0_i32 = arith.constant 0 : i32
    %c0_i32_0 = arith.constant 0 : i32
    return %c0_i32, %arg0 : i32, i32
  }
  func.func @transform_16(%arg0: i32) -> (i32, i32) {
    %c0_i32 = arith.constant 0 : i32
    %c0_i32_0 = arith.constant 0 : i32
    return %c0_i32, %arg0 : i32, i32
  }
  func.func @transform_17(%arg0: i32) -> (i32, i32) {
    %c0_i32 = arith.constant 0 : i32
    %c0_i32_0 = arith.constant 0 : i32
    %c0_i32_1 = arith.constant 0 : i32
    return %c0_i32, %c0_i32_0 : i32, i32
  }
  func.func @transform_18(%arg0: i32) -> (i32, i32) {
    %c0_i32 = arith.constant 0 : i32
    %c0_i32_0 = arith.constant 0 : i32
    return %c0_i32, %arg0 : i32, i32
  }
}

</mosaic_0001>

<bundles_post_ra>
// kernel: tpu_custom_call.1
= control target key start
LH: loop header
LB: loop body
LE: loop exit
PB: predicated region body
PF: predicated region fallthrough
CT: control target
= control target key end

     0   :  { %s2644_s0 = inlined_call_operand.vmem [shape: f32[8,600], index: 0, kind: input, shape index: {}]   ;;  %s2645_s1 = inlined_call_operand.hbm [shape: bf16[600,128], index: 1, kind: input, shape index: {}]   ;;  %s2646_s2 = inlined_call_operand.vmem [shape: f32[1,128], index: 2, kind: input, shape index: {}]   ;;  %s2647_s3 = inlined_call_operand.vmem [shape: bf16[128,64], index: 3, kind: input, shape index: {}]   ;;  %s2648_s4 = inlined_call_operand.vmem [shape: f32[1,64], index: 4, kind: input, shape index: {}]   ;;  %s2649_s5 = inlined_call_operand.vmem [shape: bf16[64,16], index: 5, kind: input, shape index: {}]   ;;  %s2650_s6 = inlined_call_operand.vmem [shape: f32[1,16], index: 6, kind: input, shape index: {}]   ;;  %s2651_s7 = inlined_call_operand.vmem [shape: bf16[16,8], index: 7, kind: input, shape index: {}]   ;;  %s2652_s8 = inlined_call_operand.vmem [shape: f32[1,8], index: 8, kind: input, shape index: {}]   ;;  %s2653_s9 = inlined_call_operand.vmem [shape: bf16[8,16], index: 9, kind: input, shape index: {}]   ;;  %s2654_s10 = inlined_call_operand.vmem [shape: f32[1,16], index: 10, kind: input, shape index: {}]   ;;  %s2655_s11 = inlined_call_operand.vmem [shape: bf16[16,64], index: 11, kind: input, shape index: {}]   ;;  %s2656_s12 = inlined_call_operand.vmem [shape: f32[1,64], index: 12, kind: input, shape index: {}]   ;;  %s2657_s13 = inlined_call_operand.vmem [shape: bf16[64,128], index: 13, kind: input, shape index: {}]   ;;  %s2658_s14 = inlined_call_operand.vmem [shape: f32[1,128], index: 14, kind: input, shape index: {}]   ;;  %s2659_s15 = inlined_call_operand.hbm [shape: bf16[128,1280], index: 15, kind: input, shape index: {}]   ;;  %s2660_s16 = inlined_call_operand.vmem [shape: f32[1,1280], index: 16, kind: input, shape index: {}]   ;;  %s2661_s17 = inlined_call_operand.hbm [shape: f32[8,8], index: 17, kind: output, shape index: {0}]   ;;  %s2662_s18 = inlined_call_operand.hbm [shape: f32[8,1280], index: 18, kind: output, shape index: {1}]  }
   0x1   :  { %2672 = sst [smem:[#allocation20_spill]] %s2644_s0 }
   0x2   :  { %2673 = sst [smem:[#allocation21_spill]] %s2645_s1 }
   0x3   :  { %2674 = sst [smem:[#allocation22_spill]] %s2646_s2 }
   0x4   :  { %2675 = sst [smem:[#allocation23_spill]] %s2658_s14 }
   0x5   :  { %2676 = sst [smem:[#allocation24_spill]] %s2660_s16 }
   0x6   :  { %2677 = sst [smem:[#allocation25_spill]] %s2661_s17 }
   0x7   :  { %2678 = sst [smem:[#allocation26_spill]] %s2662_s18 }
   0x8   :  { %24 = vsyncpa [#allocation3], 0 }
   0x9   :  { %25 = vsyncpa [#allocation6], 0 }
   0xa   :  { %27 = vsyncpa [#allocation6 + $0x1], 0 }
   0xb   :  { %28 = vsyncpa [#allocation4], 0 }
   0xc   :  { %29 = vsyncpa [#allocation9], 0 }
   0xd   :  { %31 = vsyncpa [#allocation9 + $0x1], 0  ;;  %s2359_s27 = smov 0   ;;  %s2361_s28 = smov 0  }
   0xe   :  { %s2363_s29 = smov 0   ;;  %s2365_s30 = smov 0  }
   0xf LB: > { %2679 = sst [smem:[#allocation14_spill]] %s2243_s27  ;;  %s2380_s0 = sadd.s32 4294967295, %s2255_s30   ;;  %s2255_s30 = sphi %s2365_s30, %s2704_s30   ;;  %s2251_s29 = sphi %s2363_s29, %s2706_s29   ;;  %s2247_s28 = sphi %s2361_s28, %s2708_s28   ;;  %s2243_s27 = sphi %s2359_s27, %s2707_s27  }
  0x10   : > { %2680 = sst [smem:[#allocation15_spill]] %s2251_s29  ;;  %s1627_s19 = sadd.s32 4294967294, %s2255_s30  }
  0x11   : > { %2681 = sst [smem:[#allocation16_spill]] %s2255_s30  ;;  %p372_p0 = scmp.ne.s32.totalorder %s2247_s28, %s2243_s27 }
  0x12   : > { %p373_p1 = scmp.eq.s32.totalorder %s2380_s0, 0  ;;  %p2670_p2 = scmp.eq.s32.totalorder %s2380_s0, 4 }
  0x13   : > { %p449_p3 = scmp.eq.s32.totalorder %s1627_s19, 4  ;;  %p1628_p5 = scmp.ge.s32.totalorder %s2255_s30, 1 }
  0x14   : > { %p2389_p4 = por %p373_p1, %p372_p0  ;;  %p456_p7 = scmp.lt.s32.totalorder %s2255_s30, 6 }
  0x15   : > { %p2394_p6 = por %p449_p3, %p372_p0  ;;  %s2685_s2 = sld [smem:[#allocation21_spill]] }
  0x16   : > { %p2402_p8 = pnand %p1628_p5, %p456_p7  ;;  %s2257_s25 = smov [#allocation2]  }
  0x17   : > { %s2683_s20 = scalar_select %p2394_p6, 1, 0 }
  0x18   : > { %p2021_p9 = pneg %p2402_p8  ;;  %s472_s26 = sshll.u32 %s2257_s25, 4  ;;  %s473_s26 = int_to_ptr.vmem [resolvable:$true] %s472_s26 }
  0x19   : > { %2684 = sst [smem:[#allocation17_spill]] %s2683_s20  ;;  %s2411_s19 = sadd.s32 1, %s2255_s30  }
  0x1a   : > { %p2022_p10 = pnand %p2021_p9, %p373_p1  ;;  %2687 = sst [smem:[#allocation18_spill]] %s2411_s19 }
  0x1b   : > { %s470_s23 = sshll.u32 %s2685_s2, 4  ;;  %s2258_s21 = smov 64   ;;  %s471_s23 = int_to_ptr.hbm [resolvable:$true] %s470_s23 }
  0x1c   : > { %s2259_s22 = smov 4   ;;  %s356_s2 = ssub.s32 %s2255_s30, %s2411_s19 }
  0x1d   : > { %2024 = dma.hbm_to_vmem [thread:$0]  (!%p2022_p10), %s471_s23, 4800, %s473_s26, [#allocation3], %s2258_s21, %s2258_s21, %s2259_s22  }
  0x1e   : > { %s359_s20 = sadd.s32 1, %s2251_s29  ;;  %p357_p11 = scmp.eq.s32.totalorder %s356_s2, 0 }
  0x1f   : > { %p366_p12 = scmp.ne.s32.totalorder %s2251_s29, %s2247_s28  ;;  %p367_p13 = scmp.eq.s32.totalorder %s2255_s30, 0 }
  0x20   : > { %p2034_p0 = scmp.lt.s32.totalorder %s2255_s30, 5  ;;  %s525_s18 = sand.u32 1, %s2251_s29  }
  0x21   : > { %s2421_s27 = scalar_select %p357_p11, %s2251_s29, %s359_s20  }
  0x22   : > { %p368_p3 = por %p367_p13, %p366_p12  ;;  %p2425_p5 = por %p2670_p2, %p366_p12 }
  0x23   : > { %2688 = sst [smem:[#allocation19_spill]] %s2421_s27  ;;  %s1936_s16 = sshll.u32 %s2255_s30, 3 }
  0x24   : > { %s1631_s17 = sshll.u32 %s525_s18, 7  ;;  %s534_s26 = scalar_lea.hbm %s2659_s15, %s1936_s16 }
  0x25   : > { %s535_s21 = sshll.u32 %s534_s26, 4  ;;  %s529_s22 = scalar_lea.vmem [#allocation5], %s1631_s17  ;;  %s536_s21 = int_to_ptr.hbm [resolvable:$true] %s535_s21 }
  0x26   : > { %s537_s2 = sshll.u32 %s529_s22, 4  ;;  %p2436_p7 = pnand %p2034_p0, %p368_p3  ;;  %s538_s2 = int_to_ptr.vmem [resolvable:$true] %s537_s2 }
  0x27   : > { %s526_s27 = scalar_lea.sflag [#allocation6], %s525_s18  ;;  %s2123_s19 = sshra.s32 %s536_s21, 4  ;;  %s2124_s19 = int_to_ptr.hbm [resolvable:$true] %s2123_s19 }
  0x28   : > { %s2125_s29 = scalar_lea.hbm %s2124_s19, 128  ;;  %p2127_p10 = pneg %p2436_p7 }
  0x29   : > { %p2126_p9 = scmp.ne.s32.totalorder %s2124_s19, %s2125_s29  ;;  %s2130_s17 = scalar_lea.hbm %s2659_s15, 640 }
  0x2a   : > { %p2131_p13 = scmp.lt.s32.totalorder %s2124_s19, %s2659_s15  ;;  %p2132_p0 = scmp.lt.s32.totalorder %s2130_s17, %s2125_s29 }
  0x2b   : > { %p2128_p11 = pnand %p2127_p10, %p2126_p9 }
  0x2c   : > { %p2133_p3 = por %p2132_p0, %p2131_p13 }
  0x2d   : > { %p2129_p12 = pneg %p2128_p11 }
  0x2f   : > { %p2134_p2 = pnand %p2133_p3, %p2129_p12 }
  0x31   : > { %2137 = shalt.err (!%p2134_p2)
}
  0x32   : > { %s2260_s18 = smov 640   ;;  %s2261_s22 = smov 128  }
  0x33   : > { %s2262_s30 = smov 8   ;;  %557 = sbr.rel (%p2402_p8) target bundleno = 1258 (0x4ea), region = 88 }
  0x34   : > { %2028 = dma.hbm_to_vmem [thread:$0]  (!%p2436_p7), %s536_s21, 2048, %s538_s2, %s526_s27, %s2260_s18, %s2261_s22, %s2262_s30  }
  0x38   : > { %2226 = dma.done.wait (%p373_p1), [#allocation3], 4800  }
  0x39   : > { %2228 = vsyncadd (%p373_p1), [#allocation3], 4294962496  ;;  %s2457_s29 = sand.u32 1, %s2247_s28  }
  0x3a   : > { %s1636_s19 = sshll.u32 %s2457_s29, 7  ;;  %s565_s14 = scalar_lea.sflag [#allocation6], %s2457_s29 }
  0x3b   : > { %s2461_s16 = scalar_lea.vmem [#allocation5], %s1636_s19 }
  0x3c   : > { %2230 = dma.done.wait (%p2389_p4), %s565_s14, 2048  }
  0x3d   : > { %2232 = vsyncadd (%p2389_p4), %s565_s14, 4294965248  ;;  %v1944_v0 = vld [vmem:[#allocation2 + $0x38] sm:$0xff]  ;;  %v1943_v4 = vld [vmem:[#allocation2 + $0x30] sm:$0xff]  ;;  %vm952_vm0 = vcmask 1043456   ;;  %s2691_s1 = sld [smem:[#allocation20_spill]]  ;;  %vm948_vm1 = vcmask 719872  }
  0x3e   : > { %v1960_v1 = vld [vmem:[#allocation2 + $0xb8] sm:$0xff]  ;;  %956 = vmatpush.bf16.msra.mxu0 %v1944_v0  ;;  %v1959_v5 = vld [vmem:[#allocation2 + $0xb0] sm:$0xff]  ;;  %v1942_v8 = vld [vmem:[#allocation2 + $0x28] sm:$0xff]  ;;  %s2692_s26 = sld [smem:[#allocation22_spill]]  ;;  %vm1142_vm2 = vcmask 523264   ;;  %vm1173_vm3 = vcmask 130048  }
  0x3f   : > { %v1968_v2 = vld [vmem:[#allocation2 + $0xf8] sm:$0xff]  ;;  %982 = vmatpush.bf16.msra.mxu2 %v1960_v1  ;;  %v1967_v6 = vld [vmem:[#allocation2 + $0xf0] sm:$0xff]  ;;  %v1958_v9 = vld [vmem:[#allocation2 + $0xa8] sm:$0xff]  ;;  %vm1190_vm4 = vcmask 64512   ;;  %s2693_s19 = sld [smem:[#allocation23_spill]]  ;;  %s2263_s24 = smov [#allocation7]  }
  0x40   : > { %v1952_v3 = vld [vmem:[#allocation2 + $0x78] sm:$0xff]  ;;  %995 = vmatpush.bf16.msra.mxu3 %v1968_v2  ;;  %v1951_v7 = vld [vmem:[#allocation2 + $0x70] sm:$0xff]  ;;  %v1966_v10 = vld [vmem:[#allocation2 + $0xe8] sm:$0xff]  ;;  %s2694_s30 = sld [smem:[#allocation25_spill]]  ;;  %s1504_s21 = sshll.u32 %s2263_s24, 4  ;;  %s1505_s21 = int_to_ptr.vmem [resolvable:$true] %s1504_s21 }
  0x41   : > { %969 = vmatpush.bf16.msra.mxu1 %v1952_v3  ;;  %v1950_v11 = vld [vmem:[#allocation2 + $0x68] sm:$0xff]  ;;  %v1941_v12 = vld [vmem:[#allocation2 + $0x20] sm:$0xff]  ;;  %v1940_v16 = vld [vmem:[#allocation2 + $0x18] sm:$0xff]  ;;  %p2695_p1 = scmp.eq.s32.totalorder %s2380_s0, 4  ;;  %s1638_s2 = sshll.u32 %s2380_s0, 1 }
  0x42   : > { %957 = vmatpush.bf16.msra.mxu0 %v1943_v4  ;;  %v1957_v13 = vld [vmem:[#allocation2 + $0xa0] sm:$0xff]  ;;  %v1956_v17 = vld [vmem:[#allocation2 + $0x98] sm:$0xff]  ;;  %v718_v20 = vld [vmem:[#allocation2 + $0x128] sm:$0xf]  ;;  %p628_p2 = scmp.lt.s32.totalorder %s1638_s2, 9  ;;  %s2696_s23 = sld [smem:[#allocation24_spill]] }
  0x43   : > { %983 = vmatpush.bf16.msra.mxu2 %v1959_v5  ;;  %v1965_v14 = vld [vmem:[#allocation2 + $0xe0] sm:$0xff]  ;;  %v1964_v18 = vld [vmem:[#allocation2 + $0xd8] sm:$0xff]  ;;  %v1939_v21 = vld [vmem:[#allocation2 + $0x10] sm:$0xff]  ;;  %v872_v25 = vunpack.c.l.b16 %v718_v20  ;;  %s1637_s18 = sshll.u32 %s2457_s29, 4  ;;  %s2008_s22 = sshll.u32 %s2380_s0, 4 }
  0x44   : > { %996 = vmatpush.bf16.msra.mxu3 %v1967_v6  ;;  %v1949_v15 = vld [vmem:[#allocation2 + $0x60] sm:$0xff]  ;;  %v1948_v19 = vld [vmem:[#allocation2 + $0x58] sm:$0xff]  ;;  %v1955_v22 = vld [vmem:[#allocation2 + $0x90] sm:$0xff]  ;;  %s2710_s2 = smov (!%p628_p2, %s1638_s2), 9  ;;  %s2697_s27 = sld [smem:[#allocation26_spill]] }
  0x45   : > { %970 = vmatpush.bf16.msra.mxu1 %v1951_v7  ;;  %v1963_v23 = vld [vmem:[#allocation2 + $0xd0] sm:$0xff]  ;;  %v1938_v26 = vld [vmem:[#allocation2 + $0x8] sm:$0xff]  ;;  %v910_v30 = vpack.c.b16 %v872_v25, %v872_v25  ;;  %v1937_v31 = vld [vmem:[#allocation2] sm:$0xff]  ;;  %s625_s24 = scalar_lea.vmem [#allocation8], %s1637_s18  ;;  %s1494_s20 = scalar_lea.sflag [#allocation9], %s2457_s29 }
  0x46   : > { %958 = vmatpush.bf16.msra.mxu0 %v1942_v8  ;;  %v1947_v24 = vld [vmem:[#allocation2 + $0x50] sm:$0xff]  ;;  %v1954_v27 = vld [vmem:[#allocation2 + $0x88] sm:$0xff]  ;;  %v634_v32 = vld [vmem:[%s2691_s1] sm:$0xff] }
  0x47   : > { %984 = vmatpush.bf16.msra.mxu2 %v1958_v9  ;;  %v1962_v28 = vld [vmem:[#allocation2 + $0xc8] sm:$0xff]  ;;  %v1953_v33 = vld [vmem:[#allocation2 + $0x80] sm:$0xff]  ;;  %v636_v34 = vld [vmem:[%s2691_s1 + $0x10] sm:$0xff]  ;;  %v954_v37 = vsel %vm952_vm0, %v910_v30, 0  ;;  %v639_v40 = vpack.c.bf16 %v634_v32, %v634_v32 }
  0x48   : > { %997 = vmatpush.bf16.msra.mxu3 %v1966_v10  ;;  %v1946_v29 = vld [vmem:[#allocation2 + $0x48] sm:$0xff]  ;;  %v1961_v35 = vld [vmem:[#allocation2 + $0xc0] sm:$0xff]  ;;  %v637_v36 = vld [vmem:[%s2691_s1 + $0x18] sm:$0xff]  ;;  %v641_v41 = vpack.c.bf16 %v636_v34, %v636_v34 }
  0x49   : > { %971 = vmatpush.bf16.msra.mxu1 %v1950_v11  ;;  %v1945_v38 = vld [vmem:[#allocation2 + $0x40] sm:$0xff]  ;;  %v635_v39 = vld [vmem:[%s2691_s1 + $0x8] sm:$0xff]  ;;  %v642_v42 = vpack.c.bf16 %v637_v36, %v637_v36  ;;  %v1981_v43 = vld [vmem:[%s2647_s3 + $0x38] sm:$0xff] }
  0x4a   : > { %959 = vmatpush.bf16.msra.mxu0 %v1941_v12  ;;  %v1973_v44 = vld [vmem:[#allocation2 + $0x120] sm:$0xff]  ;;  %v640_v45 = vpack.c.bf16 %v635_v39, %v635_v39  ;;  %v1972_v46 = vld [vmem:[#allocation2 + $0x118] sm:$0xff]  ;;  %v1971_v47 = vld [vmem:[#allocation2 + $0x110] sm:$0xff] }
  0x4b   : > { %985 = vmatpush.bf16.msra.mxu2 %v1957_v13  ;;  %v1970_v48 = vld [vmem:[#allocation2 + $0x108] sm:$0xff]  ;;  %v1969_v49 = vld [vmem:[#allocation2 + $0x100] sm:$0xff]  ;;  %v1980_v52 = vld [vmem:[%s2647_s3 + $0x30] sm:$0xff] }
  0x4c   : > { %998 = vmatpush.bf16.msra.mxu3 %v1965_v14  ;;  %v638_v50 = vld [vmem:[%s2691_s1 + $0x20] sm:$0xff]  ;;  %v1979_v53 = vld [vmem:[%s2647_s3 + $0x28] sm:$0xff]  ;;  %v1977_v55 = vld [vmem:[%s2647_s3 + $0x18] sm:$0xff] }
  0x4d   : > { %972 = vmatpush.bf16.msra.mxu1 %v1949_v15  ;;  %v643_v51 = vpack.c.bf16 %v638_v50, %v638_v50  ;;  %v1978_v54 = vld [vmem:[%s2647_s3 + $0x20] sm:$0xff]  ;;  %v1976_v56 = vld [vmem:[%s2647_s3 + $0x10] sm:$0xff]  ;;  %v1975_v57 = vld [vmem:[%s2647_s3 + $0x8] sm:$0xff] }
  0x4e   : > { %960 = vmatpush.bf16.msra.mxu0 %v1940_v16  ;;  %v1974_v58 = vld [vmem:[%s2647_s3] sm:$0xff]  ;;  %v1985_v59 = vld [vmem:[%s2649_s5 + $0x18] sm:$0xff]  ;;  %v1984_v60 = vld [vmem:[%s2649_s5 + $0x10] sm:$0xff] }
  0x4f   : > { %986 = vmatpush.bf16.msra.mxu2 %v1956_v17  ;;  %v1983_v63 = vld [vmem:[%s2649_s5 + $0x8] sm:$0xff]  ;;  %v2078_v0 = vld [vmem:[%s2692_s26] ss:$0 sm:$0xff]  ;;  %v1990_v39 = vld [vmem:[%s2657_s13 + $0x10] sm:$0xff]  ;;  %s630_s26 = scalar_lea.vmem %s2696_s23, %s2710_s2 }
  0x50   : > { %999 = vmatpush.bf16.msra.mxu3 %v1964_v18  ;;  %v1193_v16 = vld [vmem:[%s2653_s9] sm:$0xf] }
  0x51   : > { %973 = vmatpush.bf16.msra.mxu1 %v1948_v19  ;;  %v1202_v17 = vsel %vm952_vm0, %v1193_v16, 0  ;;  %v1982_v18 = vld [vmem:[%s2649_s5] sm:$0xff]  ;;  %v1996_v16 = vld [vmem:[%s2461_s16 + $0x24] sm:$0xf] }
  0x52   : > { %961 = vmatpush.bf16.msra.mxu0 %v1939_v21  ;;  %v1986_v19 = vld [vmem:[%s2651_s7] sm:$0xff] }
  0x53   : > { %987 = vmatpush.bf16.msra.mxu2 %v1955_v22  ;;  %v2079_v20 = vld [vmem:[%s2648_s4] ss:$0 sm:$0xff] }
  0x54   : > { %1000 = vmatpush.bf16.msra.mxu3 %v1963_v23  ;;  %v1987_v32 = vld [vmem:[%s2655_s11] sm:$0xff] }
  0x55   : > { %974 = vmatpush.bf16.msra.mxu1 %v1947_v24  ;;  %v2006_v50 = vld [vmem:[%s2461_s16 + $0x74] sm:$0xf] }
  0x56   : > { %962 = vmatpush.bf16.msra.mxu0 %v1938_v26  ;;  %v2080_v26 = vld [vmem:[%s2650_s6] ss:$0 sm:$0xff] }
  0x57   : > { %988 = vmatpush.bf16.msra.mxu2 %v1954_v27 }
  0x58   : > { %1001 = vmatpush.bf16.msra.mxu3 %v1962_v28 }
  0x59   : > { %975 = vmatpush.bf16.msra.mxu1 %v1946_v29 }
  0x5a   : > { %963 = vmatpush.bf16.msra.mxu0 %v1937_v31 }
  0x5b   : > { %989 = vmatpush.bf16.msra.mxu2 %v1953_v33  ;;  %v2081_v33 = vld [vmem:[%s2652_s8] ss:$0 sm:$0xff] }
  0x5c   : > { %1002 = vmatpush.bf16.msra.mxu3 %v1961_v35 }
  0x5d   : > { %976 = vmatpush.bf16.msra.mxu1 %v1945_v38  ;;  %964 = vmatmul.bf16.vlgmr.msra.gmra.mxu0 %v639_v40  ;;  %v1991_v38 = vld [vmem:[%s2657_s13 + $0x18] sm:$0xff]  ;;  %v1989_v40 = vld [vmem:[%s2657_s13 + $0x8] sm:$0xff] }
  0x5e   : > { %1010 = vmatpush.bf16.msrb.mxu0 %v954_v37  ;;  %990 = vmatmul.bf16.vlgmr.msra.gmra.mxu2 %v641_v41  ;;  %v2082_v41 = vld [vmem:[%s2654_s10] ss:$0 sm:$0xff] }
  0x5f   : > { %1003 = vmatmul.bf16.vlgmr.msra.gmra.mxu3 %v642_v42  ;;  %1150 = vmatpush.bf16.msrb.mxu2 %v1985_v59 }
  0x60   : > { %977 = vmatmul.bf16.vlgmr.msra.gmra.mxu1 %v640_v45  ;;  %1184 = vmatpush.bf16.msrb.mxu3 %v1986_v19 }
  0x61   : > { %1091 = vmatpush.bf16.msrb.mxu1 %v1981_v43 }
  0x62   : > { %1011 = vmatpush.bf16.msrb.mxu0 %v1973_v44 }
  0x63   : > { %1151 = vmatpush.bf16.msrb.mxu2 %v1984_v60  ;;  %v1907_v60 = vld [vmem:[%s2461_s16 + $0x50] sm:$0xf] }
  0x64   : > { %1241 = vmatpush.bf16.msra.mxu3 %v1987_v32  ;;  %v1867_v32 = vld [vmem:[%s2461_s16] sm:$0xf] }
  0x65   : > { %1092 = vmatpush.bf16.msrb.mxu1 %v1980_v52  ;;  %v1925_v52 = vld [vmem:[%s2461_s16 + $0x78] sm:$0xf0] }
  0x66   : > { %1012 = vmatpush.bf16.msrb.mxu0 %v1972_v46 }
  0x67   : > { %1152 = vmatpush.bf16.msrb.mxu2 %v1983_v63  ;;  %v1909_v63 = vld [vmem:[%s2461_s16 + $0x58] sm:$0xf0] }
  0x69   : > { %1093 = vmatpush.bf16.msrb.mxu1 %v1979_v53  ;;  %v1915_v53 = vld [vmem:[%s2461_s16 + $0x60] sm:$0xf] }
  0x6a   : > { %1013 = vmatpush.bf16.msrb.mxu0 %v1971_v47  ;;  %v1988_v47 = vld [vmem:[%s2657_s13] sm:$0xff] }
  0x6b   : > { %1153 = vmatpush.bf16.msrb.mxu2 %v1982_v18 }
  0x6d   : > { %1094 = vmatpush.bf16.msrb.mxu1 %v1978_v54  ;;  %v2005_v54 = vld [vmem:[%s2461_s16 + $0x64] sm:$0xf0] }
  0x6e   : > { %1014 = vmatpush.bf16.msrb.mxu0 %v1970_v48  ;;  %v1923_v48 = vld [vmem:[%s2461_s16 + $0x70] sm:$0xf] }
  0x6f   : > { %1211 = vmatpush.bf16.msra.mxu2 %v1202_v17  ;;  %v1885_v17 = vld [vmem:[%s2461_s16 + $0x28] sm:$0xf0] }
  0x70   : > { %v1888_v19 = vor.u32 %v1996_v16, %v1885_v17 }
  0x71   : > { %1095 = vmatpush.bf16.msrb.mxu1 %v1977_v55  ;;  %v1928_v55 = vor.u32 %v2006_v50, %v1925_v52 }
  0x72   : > { %1015 = vmatpush.bf16.msrb.mxu0 %v1969_v49  ;;  %v2007_v49 = vld [vmem:[%s2461_s16 + $0x74] sm:$0xf0] }
  0x75   : > { %1787 = vmatmul.msk.bf16.vlgmr.msrb.gmra.mxu0 %vm948_vm1, %v643_v51  ;;  %1096 = vmatpush.bf16.msrb.mxu1 %v1976_v56  ;;  %v1924_v51 = vor.u32 %v2007_v49, %v1923_v48  ;;  %v2004_v56 = vld [vmem:[%s2461_s16 + $0x64] sm:$0xf] }
  0x76   : > { %1292 = vmatpush.bf16.msra.mxu0 %v1991_v38  ;;  %v2084_v38 = vld [vmem:[%s2693_s19] ss:$0 sm:$0xff] }
  0x79   : > { %1097 = vmatpush.bf16.msrb.mxu1 %v1975_v57  ;;  %v1917_v57 = vld [vmem:[%s2461_s16 + $0x68] sm:$0xf0] }
  0x7a   : > { %1293 = vmatpush.bf16.msra.mxu0 %v1990_v39  ;;  %v1920_v59 = vor.u32 %v2004_v56, %v1917_v57 }
  0x7d   : > { %1098 = vmatpush.bf16.msrb.mxu1 %v1974_v58  ;;  %v1916_v58 = vor.u32 %v2005_v54, %v1915_v53 }
  0x7e   : > { %1294 = vmatpush.bf16.msra.mxu0 %v1989_v40 }
  0x81   : > { %1405 = vmatpush.bf16.msra.mxu1 %v1924_v51 }
  0x82   : > { %1295 = vmatpush.bf16.msra.mxu0 %v1988_v47 }
  0x85   : > { %1406 = vmatpush.bf16.msra.mxu1 %v1916_v58 }
  0xda   : > { %v965_v61 = vpop.f32.mrf.mxu0 }
  0xdb   : > { %v966_v3 = vadd.f32 %v2078_v0, %v965_v61  ;;  %v2003_v61 = vld [vmem:[%s2461_s16 + $0x54] sm:$0xf0] }
  0xdc   : > { %v1908_v0 = vor.u32 %v2003_v61, %v1907_v60 }
  0xdd   : > { %v978_v62 = vpop.f32.mrf.mxu1 }
  0xde   : > { %v979_v6 = vadd.f32 %v978_v62, %v966_v3  ;;  %v2002_v62 = vld [vmem:[%s2461_s16 + $0x54] sm:$0xf]  ;;  %v2001_v3 = vld [vmem:[%s2461_s16 + $0x44] sm:$0xf0]  ;;  %1407 = vmatpush.bf16.msra.mxu1 %v1908_v0 }
  0xe1   : > { %v991_v1 = vpop.f32.mrf.mxu2 }
  0xe2   : > { %v1004_v2 = vpop.f32.mrf.mxu3  ;;  %v967_v4 = vpop.f32.mrf.mxu0  ;;  %v992_v9 = vadd.f32 %v991_v1, %v979_v6  ;;  %v1912_v1 = vor.u32 %v2002_v62, %v1909_v63 }
  0xe3   : > { %v2000_v4 = vld [vmem:[%s2461_s16 + $0x44] sm:$0xf] }
  0xe4   : > { %v1005_v10 = vadd.f32 %v1004_v2, %v992_v9  ;;  %v1899_v2 = vld [vmem:[%s2461_s16 + $0x40] sm:$0xf]  ;;  %v1999_v9 = vld [vmem:[%s2461_s16 + $0x34] sm:$0xf0] }
  0xe5   : > { %v980_v5 = vpop.f32.mrf.mxu1  ;;  %v1900_v6 = vor.u32 %v2001_v3, %v1899_v2 }
  0xe6   : > { %v1901_v5 = vld [vmem:[%s2461_s16 + $0x48] sm:$0xf0] }
  0xe7   : > { %1408 = vmatpush.bf16.msra.mxu1 %v1900_v6 }
  0xe9   : > { %v993_v7 = vpop.f32.mrf.mxu2 }
  0xea   : > { %v1006_v8 = vpop.f32.mrf.mxu3  ;;  %v1904_v7 = vor.u32 %v2000_v4, %v1901_v5 }
  0xeb   : > { %v1891_v8 = vld [vmem:[%s2461_s16 + $0x30] sm:$0xf] }
  0xf2   : > { %v1017_v11 = vpop.f32.mrf.mxu0 }
  0xf3   : > { %v1018_v12 = vadd.f32 %v1017_v11, %v1005_v10  ;;  %v1998_v10 = vld [vmem:[%s2461_s16 + $0x34] sm:$0xf]  ;;  %v1893_v11 = vld [vmem:[%s2461_s16 + $0x38] sm:$0xf0] }
  0xf5   : > { %v1021_v13 = vmax.f32 %v1018_v12, 0.0  ;;  %v1892_v12 = vor.u32 %v1999_v9, %v1891_v8 }
  0xf7   : > { %v1022_v14 = vpack.c.bf16 %v1021_v13, %v1021_v13  ;;  %v1896_v13 = vor.u32 %v1998_v10, %v1893_v11  ;;  %1409 = vmatpush.bf16.msra.mxu1 %v1892_v12 }
  0xf9   : > { %1099 = vmatmul.bf16.vlgmr.msrb.gmra.mxu1 %v1022_v14  ;;  %v1883_v14 = vld [vmem:[%s2461_s16 + $0x20] sm:$0xf] }
  0xfa   : > { %v1019_v15 = vpop.f32.mrf.mxu0 }
  0xfb   : > { %v1997_v15 = vld [vmem:[%s2461_s16 + $0x24] sm:$0xf0] }
  0xfc   : > { %v1884_v18 = vor.u32 %v1997_v15, %v1883_v14 }
  0xfe   : > { %1410 = vmatpush.bf16.msra.mxu1 %v1884_v18 }
 0x176   : > { %v1100_v21 = vpop.f32.mrf.mxu1 }
 0x177   : > { %v1101_v22 = vadd.f32 %v2079_v20, %v1100_v21  ;;  %v2083_v20 = vld [vmem:[%s2656_s12] ss:$0 sm:$0xff] }
 0x179   : > { %v1104_v23 = vmax.f32 %v1101_v22, 0.0 }
 0x17b   : > { %v1105_v24 = vpack.c.bf16 %v1104_v23, %v1104_v23 }
 0x17d   : > { %1836 = vmatmul.msk.bf16.vlgmr.msrb.gmra.mxu2 %vm1142_vm2, %v1105_v24 }
 0x17e   : > { %v1102_v25 = vpop.f32.mrf.mxu1  ;;  %1418 = vmatpush.bf16.msrb.mxu2 %v1928_v55 }
 0x182   : > { %1419 = vmatpush.bf16.msrb.mxu2 %v1920_v59 }
 0x186   : > { %1420 = vmatpush.bf16.msrb.mxu2 %v1912_v1 }
 0x18a   : > { %1421 = vmatpush.bf16.msrb.mxu2 %v1904_v7 }
 0x18e   : > { %1422 = vmatpush.bf16.msrb.mxu2 %v1896_v13 }
 0x192   : > { %1423 = vmatpush.bf16.msrb.mxu2 %v1888_v19 }
 0x200   : > { %v1155_v27 = vpop.f32.mrf.mxu2 }
 0x201   : > { %v1156_v28 = vadd.f32 %v2080_v26, %v1155_v27  ;;  %v1875_v26 = vld [vmem:[%s2461_s16 + $0x10] sm:$0xf]  ;;  %v1995_v27 = vld [vmem:[%s2461_s16 + $0x14] sm:$0xf0] }
 0x203   : > { %v1159_v29 = vmax.f32 %v1156_v28, 0.0  ;;  %v1994_v28 = vld [vmem:[%s2461_s16 + $0x14] sm:$0xf] }
 0x205   : > { %v1160_v30 = vpack.c.bf16 %v1159_v29, %v1159_v29  ;;  %v1876_v29 = vor.u32 %v1995_v27, %v1875_v26 }
 0x207   : > { %1841 = vmatmul.msk.bf16.vlgmr.msrb.gmra.mxu3 %vm1173_vm3, %v1160_v30  ;;  %v1877_v30 = vld [vmem:[%s2461_s16 + $0x18] sm:$0xf0]  ;;  %1411 = vmatpush.bf16.msra.mxu1 %v1876_v29 }
 0x208   : > { %v1157_v31 = vpop.f32.mrf.mxu2 }
 0x209   : > { %v1880_v31 = vor.u32 %v1994_v28, %v1877_v30 }
 0x20b   : > { %1424 = vmatpush.bf16.msrb.mxu2 %v1880_v31 }
 0x28a   : > { %v1186_v34 = vpop.f32.mrf.mxu3 }
 0x28b   : > { %v1187_v35 = vadd.f32 %v2081_v33, %v1186_v34  ;;  %v1993_v33 = vld [vmem:[%s2461_s16 + $0x4] sm:$0xf0]  ;;  %v1992_v34 = vld [vmem:[%s2461_s16 + $0x4] sm:$0xf] }
 0x28d   : > { %v1192_v36 = vpack.c.bf16 %v1187_v35, %v1187_v35  ;;  %1191 = vst.msk [vmem:[#allocation7] sm:$0xff] %vm1190_vm4, %v1187_v35  ;;  %v1868_v35 = vor.u32 %v1993_v33, %v1867_v32 }
 0x28f   : > { %1842 = vmatmul.msk.bf16.vlgmr.msra.gmra.mxu2 %vm1190_vm4, %v1192_v36  ;;  %v1869_v36 = vld [vmem:[%s2461_s16 + $0x8] sm:$0xf0]  ;;  %1412 = vmatpush.bf16.msra.mxu1 %v1868_v35  ;;  %s1506_s16 = sshll.u32 %s2694_s30, 4  ;;  %s1517_s30 = scalar_lea.hbm %s2697_s27, %s2008_s22  ;;  %s1507_s16 = int_to_ptr.hbm [resolvable:$true] %s1506_s16 }
 0x290   : > { %2016 = dma.vmem_to_hbm [thread:$0]  (%p2695_p1), %s1505_s21, 128, %s1507_s16, [#allocation4]  }
 0x291   : > { %s2698_s16 = smov %s2697_s27  ;;  %s1519_s21 = sshll.u32 %s625_s24, 4  ;;  %s1520_s21 = int_to_ptr.vmem [resolvable:$true] %s1519_s21 }
 0x292   : > { %v1188_v37 = vpop.f32.mrf.mxu3  ;;  %s1521_s2 = sshll.u32 %s1517_s30, 4  ;;  %s2201_s22 = scalar_lea.hbm %s2698_s16, 80  ;;  %s1522_s2 = int_to_ptr.hbm [resolvable:$true] %s1521_s2 }
 0x293   : > { %v1872_v37 = vor.u32 %v1992_v34, %v1869_v36  ;;  %s2195_s17 = sshra.s32 %s1522_s2, 4  ;;  %s2196_s17 = int_to_ptr.hbm [resolvable:$true] %s2195_s17 }
 0x294   : > { %s2197_s23 = scalar_lea.hbm %s2196_s17, 16  ;;  %p2202_p9 = scmp.lt.s32.totalorder %s2196_s17, %s2698_s16 }
 0x295   : > { %1425 = vmatpush.bf16.msrb.mxu2 %v1872_v37  ;;  %p2198_p4 = scmp.ne.s32.totalorder %s2196_s17, %s2197_s23  ;;  %p2203_p10 = scmp.lt.s32.totalorder %s2201_s22, %s2197_s23 }
 0x297   : > { %p2199_p8 = pnand %p2198_p4, %p2425_p5  ;;  %p2204_p11 = por %p2203_p10, %p2202_p9 }
 0x299   : > { %p2200_p7 = pneg %p2199_p8 }
 0x29b   : > { %p2205_p12 = pnand %p2204_p11, %p2200_p7 }
 0x312   : > { %v1213_v42 = vpop.f32.mrf.mxu2 }
 0x313   : > { %v1214_v43 = vadd.f32 %v2082_v41, %v1213_v42 }
 0x315   : > { %v1217_v44 = vmax.f32 %v1214_v43, 0.0 }
 0x317   : > { %v1218_v45 = vpack.c.bf16 %v1217_v44, %v1217_v44  ;;  %v1319_v44 = vld [vmem:[%s630_s26] sm:$0x3] }
 0x318   : > { %v1322_v49 = vperm.slane %v1319_v44, 1 }
 0x319   : > { %1847 = vmatmul.msk.bf16.vlgmr.msra.gmra.mxu3 %vm1173_vm3, %v1218_v45  ;;  %v1321_v45 = vperm.slane %v1319_v44, 0 }
 0x31a   : > { %v1215_v46 = vpop.f32.mrf.mxu2 }
 0x39c   : > { %v1243_v21 = vpop.f32.mrf.mxu3 }
 0x39d   : > { %v1244_v22 = vadd.f32 %v2083_v20, %v1243_v21 }
 0x39f   : > { %v1247_v23 = vmax.f32 %v1244_v22, 0.0 }
 0x3a1   : > { %v1248_v24 = vpack.c.bf16 %v1247_v23, %v1247_v23 }
 0x3a3   : > { %1864 = vmatmul.msk.bf16.vlgmr.msra.gmra.mxu0 %vm1142_vm2, %v1248_v24 }
 0x3a4   : > { %v1245_v25 = vpop.f32.mrf.mxu3 }
 0x420   : > { %v1297_v39 = vpop.f32.mrf.mxu0 }
 0x421   : > { %v1298_v40 = vadd.f32 %v2084_v38, %v1297_v39 }
 0x423   : > { %v1301_v41 = vmax.f32 %v1298_v40, 0.0 }
 0x425   : > { %v1302_v42 = vpack.c.bf16 %v1301_v41, %v1301_v41 }
 0x427   : > { %1413 = vmatmul.bf16.vlgmr.msra.gmra.mxu1 %v1302_v42  ;;  %1426 = vmatmul.bf16.vlgmr.msrb.gmra.mxu2 %v1302_v42 }
 0x428   : > { %v1299_v43 = vpop.f32.mrf.mxu0 }
 0x4a4   : > { %v1414_v46 = vpop.f32.mrf.mxu1 }
 0x4a5   : > { %v1415_v47 = vadd.f32 %v1414_v46, %v1321_v45 }
 0x4a7   : > { %v1431_v48 = vrot.slane %v1415_v47, 4 }
 0x4a9   : > { %v1432_v50 = vmax.f32 %v1415_v47, %v1431_v48 }
 0x4aa   : > { %v1427_v51 = vpop.f32.mrf.mxu2 }
 0x4ab   : > { %v1433_v52 = vrot.slane %v1432_v50, 2  ;;  %v1428_v53 = vadd.f32 %v1427_v51, %v1322_v49 }
 0x4ac   : > { %v1416_v54 = vpop.f32.mrf.mxu1 }
 0x4ad   : > { %v1434_v55 = vmax.f32 %v1432_v50, %v1433_v52  ;;  %v1437_v56 = vrot.slane %v1428_v53, 4 }
 0x4af   : > { %v1435_v57 = vrot.slane %v1434_v55, 1  ;;  %v1438_v58 = vmax.f32 %v1428_v53, %v1437_v56 }
 0x4b1   : > { %v1436_v59 = vmax.f32 %v1434_v55, %v1435_v57  ;;  %v1439_v60 = vrot.slane %v1438_v58, 2 }
 0x4b2   : > { %v1429_v61 = vpop.f32.mrf.mxu2 }
 0x4b3   : > { %v1443_v62 = vsub.f32 %v1415_v47, %v1436_v59  ;;  %v1440_v63 = vmax.f32 %v1438_v58, %v1439_v60 }
 0x4b5   : > { %v1445_v0 = vmul.f32 1.442695, %v1443_v62  ;;  %v1441_v1 = vrot.slane %v1440_v63, 1 }
 0x4b7   : > { %2085 = vpow2.f32 %v1445_v0  ;;  %v1442_v2 = vmax.f32 %v1440_v63, %v1441_v1 }
 0x4b9   : > { %v1444_v3 = vsub.f32 %v1428_v53, %v1442_v2 }
 0x4bb   : > { %v1447_v4 = vmul.f32 1.442695, %v1444_v3 }
 0x4bd   : > { %v2086_v5 = vpop.eup %2085  ;;  %2087 = vpow2.f32 %v1447_v4 }
 0x4be   : > { %v1449_v6 = vrot.slane %v2086_v5, 4 }
 0x4c0   : > { %v1450_v7 = vadd.f32 %v2086_v5, %v1449_v6 }
 0x4c2   : > { %v1451_v8 = vrot.slane %v1450_v7, 2 }
 0x4c3   : > { %v2088_v9 = vpop.eup %2087 }
 0x4c4   : > { %v1452_v10 = vadd.f32 %v1451_v8, %v1450_v7  ;;  %v1455_v11 = vrot.slane %v2088_v9, 4 }
 0x4c6   : > { %v1453_v12 = vrot.slane %v1452_v10, 1  ;;  %v1456_v13 = vadd.f32 %v2088_v9, %v1455_v11 }
 0x4c8   : > { %v1454_v14 = vadd.f32 %v1453_v12, %v1452_v10  ;;  %v1457_v15 = vrot.slane %v1456_v13, 2 }
 0x4ca   : > { %2089 = vrcp.f32 %v1454_v14  ;;  %v1458_v16 = vadd.f32 %v1457_v15, %v1456_v13  ;;  %v1472_v22 = vand.u32 2147483648, %v1454_v14  ;;  %v1470_v24 = vand.u32 2147483647, %v1454_v14 }
 0x4cb   : > { %vm1466_vm6 = vweird.f32 %v1454_v14 }
 0x4cc   : > { %v1459_v17 = vrot.slane %v1458_v16, 1  ;;  %v1473_v28 = vor.u32 1.1754944e-38, %v1472_v22  ;;  %vm1471_vm8 = vcmp.eq.f32.partialorder %v1470_v24, 8.507059e+37 }
 0x4ce   : > { %v1460_v18 = vadd.f32 %v1459_v17, %v1458_v16 }
 0x4d0   : > { %v2090_v19 = vpop.eup %2089  ;;  %2091 = vrcp.f32 %v1460_v18  ;;  %v1486_v32 = vand.u32 2147483648, %v1460_v18  ;;  %v1484_v34 = vand.u32 2147483647, %v1460_v18  ;;  %vm1480_vm10 = vweird.f32 %v1460_v18 }
 0x4d1   : > { %v1462_v20 = vmul.f32 %v2090_v19, %v1454_v14  ;;  %vm1467_vm5 = vweird.f32 %v2090_v19 }
 0x4d2   : > { %vm1468_vm7 = vmor %vm1466_vm6, %vm1467_vm5  ;;  %v1487_v37 = vor.u32 1.1754944e-38, %v1486_v32  ;;  %vm1485_vm12 = vcmp.eq.f32.partialorder %v1484_v34, 8.507059e+37 }
 0x4d3   : > { %v1463_v21 = vsub.f32 1.0, %v1462_v20 }
 0x4d5   : > { %v1464_v23 = vmul.f32 %v2090_v19, %v1463_v21 }
 0x4d6   : > { %v2092_v25 = vpop.eup %2091 }
 0x4d7   : > { %v1465_v26 = vadd.f32 %v2090_v19, %v1464_v23  ;;  %v1476_v27 = vmul.f32 %v2092_v25, %v1460_v18  ;;  %vm1481_vm9 = vweird.f32 %v2092_v25 }
 0x4d8   : > { %vm1482_vm11 = vmor %vm1480_vm10, %vm1481_vm9 }
 0x4d9   : > { %v1469_v29 = vsel %vm1468_vm7, %v2090_v19, %v1465_v26  ;;  %v1477_v30 = vsub.f32 1.0, %v1476_v27 }
 0x4da   : > { %v1474_v31 = vsel %vm1471_vm8, %v1473_v28, %v1469_v29 }
 0x4db   : > { %v1478_v33 = vmul.f32 %v2092_v25, %v1477_v30  ;;  %v1489_v35 = vmul.f32 %v2086_v5, %v1474_v31 }
 0x4dd   : > { %v1479_v36 = vadd.f32 %v2092_v25, %v1478_v33  ;;  %1491 = vst [vmem:[%s625_s24] sm:$0xff] %v1489_v35 }
 0x4df   : > { %v1483_v38 = vsel %vm1482_vm11, %v2092_v25, %v1479_v36 }
 0x4e0   : > { %v1488_v39 = vsel %vm1485_vm12, %v1487_v37, %v1483_v38 }
 0x4e1   : > { %v1490_v40 = vmul.f32 %v2088_v9, %v1488_v39 }
 0x4e3   : > { %1492 = vst [vmem:[%s625_s24 + $0x8] sm:$0xff] %v1490_v40 }
 0x4e4   : > { %2208 = shalt.err (!%p2205_p12)
}
 0x4e5   : > { %2017 = dma.vmem_to_hbm [thread:$0]  (%p2425_p5), %s1520_s21, 256, %s1522_s2, %s1494_s20  }
 0x4e6   : > { %p2699_p13 = pmov %p2695_p1 }
 0x4e7   : > { %p2700_p0 = pmov %p2695_p1 }
 0x4e8   : > { %2234 = dma.done.wait (%p2699_p13), [#allocation4], 128  }
 0x4e9   : > { %2236 = vsyncadd (%p2700_p0), [#allocation4], 4294967168 }
 0x4ea PF: > { %s2701_s29 = sld [smem:[#allocation16_spill]] }
 0x4eb   : > { %s2702_s27 = sld [smem:[#allocation14_spill]] }
 0x4f0   : > { %p2038_p3 = scmp.ge.s32.totalorder %s2701_s29, 2 }
 0x4f1   : > { %s1538_s24 = sand.u32 1, %s2702_s27  }
 0x4f2   : > { %p2030_p1 = pnand %p2038_p3, %p2394_p6  ;;  %s1539_s17 = scalar_lea.sflag [#allocation9], %s1538_s24 }
 0x4f4   : > { %p2031_p2 = pneg %p2030_p1 }
 0x4f6   : > { %2238 = dma.done.wait (%p2031_p2), %s1539_s17, 256  }
 0x4f7   : > { %2240 = vsyncadd (%p2031_p2), %s1539_s17, 4294967040  ;;  %s2704_s30 = sld [smem:[#allocation18_spill]]  ;;  %s2707_s27 = smov %s2247_s28 }
 0x4f8   : > { %s2705_s25 = sld [smem:[#allocation15_spill]] }
 0x4f9   : > { %s2706_s29 = sld [smem:[#allocation19_spill]] }
 0x4fd   : > { %p34_p5 = scmp.ge.s32.totalorder %s2704_s30, 7  }
 0x4fe   : > { %s2708_s28 = smov %s2705_s25 }
 0x4ff   :  { %36 = sbr.rel (!%p34_p5) target bundleno = 15 (0xf), region = 150 }
 0x504   :  { %1545 = vsyncpa [#allocation3], 1 }
 0x505   :  { %1547 = vsyncpa [#allocation3 + $0x1], 1 }
 0x506   :  { %1548 = vsyncpa [#allocation6], 1 }
 0x507   :  { %1550 = vsyncpa [#allocation6 + $0x1], 1 }
 0x508   :  { %1551 = vsyncpa [#allocation4], 1 }
 0x509   :  { %1553 = vsyncpa [#allocation4 + $0x1], 1 }
 0x50a   :  { %1554 = vsyncpa [#allocation9], 1 }
 0x50b   :  { %1556 = vsyncpa [#allocation9 + $0x1], 1 }

</bundles_post_ra>
